<compile_context>
chip_gen: v7x
topology: tpu7x:2x2x1
jax: 0.10.0
libtpu: 0.0.40
codegen_flags: <defaults>
</compile_context>

<pallas_src>
import jax
import jax.numpy as jnp
from jax import lax
from jax.experimental import pallas as pl
from jax.experimental.pallas import tpu as pltpu


def deep_svdd_kernel(x_ref, w1_ref, b1_ref, w2_ref, b2_ref, w3_ref, b3_ref, o_ref):
    # x_ref: [tb, d_in].  All activations are kept batch-on-lanes: [features, tb].
    x = x_ref[...]
    # h1 = relu(W1 @ x^T + b1): contract both operands on their last axis so the
    # "transpose" happens in the MXU feed, not as extra HBM traffic.
    h1 = lax.dot_general(
        w1_ref[...], x, (((1,), (1,)), ((), ())),
        preferred_element_type=jnp.float32,
    )
    h1 = jnp.maximum(h1 + b1_ref[...], 0.0)
    h2 = jnp.maximum(
        jnp.dot(w2_ref[...], h1, preferred_element_type=jnp.float32) + b2_ref[...],
        0.0,
    )
    h3 = jnp.maximum(
        jnp.dot(w3_ref[...], h2, preferred_element_type=jnp.float32) + b3_ref[...],
        0.0,
    )
    o_ref[...] = h3  # [h4, tb]: lane-dense store (batch on lanes).


def _cdiv(a, b):
    return -(-a // b)


def deep_svdd_forward(x, params, *, batch_tile=None, max_batch_tile=32768):
    """x: [B, d_in] float32.

    params: dict of w1,b1,w2,b2,w3,b3 with PyTorch layout w: [out, in], b: [out, 1].
    Returns [B, hidden_dim // 4] float32, matching the relu-MLP forward of the spec.
    """
    B, d_in = x.shape
    w1, b1 = params["w1"], params["b1"]
    w2, b2 = params["w2"], params["b2"]
    w3, b3 = params["w3"], params["b3"]
    h4 = w3.shape[0]
    assert w1.shape[1] == d_in

    # Tile selection: multiples of 128 rows (lane-dense output blocks), capped
    # at max_batch_tile for VMEM, and >=2 tiles whenever the batch allows so the
    # "parallel" grid axis can be sharded across v7x's 2 TensorCores.
    units = _cdiv(B, 128)  # number of 128-row lane granules
    if batch_tile is None:
        cap_units = max(1, max_batch_tile // 128)
        min_tiles = 2 if units >= 2 else 1
        n_tiles = max(min_tiles, _cdiv(units, cap_units))
        tb = _cdiv(units, n_tiles) * 128
    else:
        tb = batch_tile
        assert tb % 128 == 0, "batch_tile must be a multiple of 128"
        n_tiles = _cdiv(B, tb)

    Bp = n_tiles * tb
    # Padding waste is <= 127 rows plus tile balancing (never a full large tile);
    # the copy is skipped entirely when the batch is already aligned.
    xp = x if Bp == B else jnp.pad(x, ((0, Bp - B), (0, 0)))

    resident = lambda shp: pl.BlockSpec(shp, lambda i: (0, 0))  # VMEM-resident

    out_t = pl.pallas_call(
        deep_svdd_kernel,
        out_shape=jax.ShapeDtypeStruct((h4, Bp), jnp.float32),
        grid=(n_tiles,),
        in_specs=[
            pl.BlockSpec((tb, d_in), lambda i: (i, 0)),  # x tile, batch-major
            resident(w1.shape), resident(b1.shape),
            resident(w2.shape), resident(b2.shape),
            resident(w3.shape), resident(b3.shape),
        ],
        out_specs=pl.BlockSpec((h4, tb), lambda i: (0, i)),
        compiler_params=pltpu.CompilerParams(
            dimension_semantics=("parallel",),
        ),
    )(xp, w1, b1, w2, b2, w3, b3)

    # The kernel's natural output is the lane-dense [h4, Bp] slab.  The module
    # spec returns [B, h4]; this transpose is only 4*h4*B (= 32*B) bytes.
    # Consumers that can take [h4, B] directly (e.g. a fused SVDD distance)
    # should read out_t[:, :B] instead and skip it.
    return out_t[:, :B].T


def init_params(key, input_dim, hidden_dim):
    """Deterministic init mimicking PyTorch nn.Linear (uniform +-1/sqrt(fan_in)).

    Weights use PyTorch's native [out, in] layout; biases are [out, 1].
    """
    dims = [
        (input_dim, hidden_dim),
        (hidden_dim, hidden_dim // 2),
        (hidden_dim // 2, hidden_dim // 4),
    ]
    params = {}
    for idx, (fan_in, fan_out) in enumerate(dims, start=1):
        key, kw, kb = jax.random.split(key, 3)
        bound = 1.0 / jnp.sqrt(jnp.float32(fan_in))
        params[f"w{idx}"] = jax.random.uniform(
            kw, (fan_out, fan_in), jnp.float32, -bound, bound
        )
        params[f"b{idx}"] = jax.random.uniform(
            kb, (fan_out, 1), jnp.float32, -bound, bound
        )
    return params


def reference_forward(x, params):
    h = jnp.maximum(x @ params["w1"].T + params["b1"].T, 0.0)
    h = jnp.maximum(h @ params["w2"].T + params["b2"].T, 0.0)
    h = jnp.maximum(h @ params["w3"].T + params["b3"].T, 0.0)
    return h


if __name__ == "__main__":
    input_dim = 16
    hidden_dim = 32  # layers: 16 -> 32 -> 16 -> 8

    key = jax.random.PRNGKey(0)
    key, kx1, kx2 = jax.random.split(key, 3)
    params = init_params(key, input_dim, hidden_dim)

    # Case 1: aligned batch with explicit 128-row tiles -> grid=(2,), pipelined
    # and shardable across both v7x TensorCores.
    x1 = jax.random.normal(kx1, (256, input_dim), jnp.float32)
    out1 = jax.block_until_ready(deep_svdd_forward(x1, params, batch_tile=128))
    ref1 = reference_forward(x1, params)
    assert out1.shape == (256, hidden_dim // 4)
    assert jnp.allclose(out1, ref1, atol=1e-5, rtol=1e-5)

    # Case 2: ragged batch with automatic tiling -> lane-padded (<=127 extra
    # rows), sliced back in the wrapper.
    x2 = jax.random.normal(kx2, (200, input_dim), jnp.float32)
    out2 = jax.block_until_ready(deep_svdd_forward(x2, params))
    ref2 = reference_forward(x2, params)
    assert out2.shape == (200, hidden_dim // 4)
    assert jnp.allclose(out2, ref2, atol=1e-5, rtol=1e-5)

    print("KERNEL_OK")
</pallas_src>

<mosaic_0001>
module attributes {stable_mosaic.version = 11 : i64} {
  func.func @deep_svdd_kernel(%arg0: i32, %arg1: memref<128x16xf32, #tpu.memory_space<vmem>>, %arg2: memref<32x16xf32, #tpu.memory_space<vmem>>, %arg3: memref<32x1xf32, #tpu.memory_space<vmem>>, %arg4: memref<16x32xf32, #tpu.memory_space<vmem>>, %arg5: memref<16x1xf32, #tpu.memory_space<vmem>>, %arg6: memref<8x16xf32, #tpu.memory_space<vmem>>, %arg7: memref<8x1xf32, #tpu.memory_space<vmem>>, %arg8: memref<8x128xf32, #tpu.memory_space<vmem>>) attributes {dimension_semantics = [#tpu.dimension_semantics<parallel>], iteration_bounds = array<i64: 2>, scalar_prefetch = 0 : i64, scratch_operands = 0 : i64, tpu.core_type = #tpu.core_type<tc>, window_params = [{transform_indices = @transform_0, window_bounds = array<i64: 128, 16>}, {pipeline_mode = #tpu.pipeline_mode<synchronous>, transform_indices = @transform_1, window_bounds = array<i64: 32, 16>}, {pipeline_mode = #tpu.pipeline_mode<synchronous>, transform_indices = @transform_2, window_bounds = array<i64: 32, 1>}, {pipeline_mode = #tpu.pipeline_mode<synchronous>, transform_indices = @transform_3, window_bounds = array<i64: 16, 32>}, {pipeline_mode = #tpu.pipeline_mode<synchronous>, transform_indices = @transform_4, window_bounds = array<i64: 16, 1>}, {pipeline_mode = #tpu.pipeline_mode<synchronous>, transform_indices = @transform_5, window_bounds = array<i64: 8, 16>}, {pipeline_mode = #tpu.pipeline_mode<synchronous>, transform_indices = @transform_6, window_bounds = array<i64: 8, 1>}, {transform_indices = @transform_7, window_bounds = array<i64: 8, 128>}]} {
    %c0 = arith.constant 0 : index
    %c0_0 = arith.constant 0 : index
    %0 = vector.load %arg1[%c0, %c0_0] : memref<128x16xf32, #tpu.memory_space<vmem>>, vector<128x16xf32>
    %c0_1 = arith.constant 0 : index
    %c0_2 = arith.constant 0 : index
    %1 = vector.load %arg2[%c0_1, %c0_2] : memref<32x16xf32, #tpu.memory_space<vmem>>, vector<32x16xf32>
    %cst = arith.constant dense<0.000000e+00> : vector<32x128xf32>
    %2 = tpu.matmul %1, %0, %cst {dimension_numbers = #tpu.dot_dimension_numbers<[1], [1], [0], [0], [0, 0, 1, 0], [], []>} : vector<32x16xf32>, vector<128x16xf32>, vector<32x128xf32> -> vector<32x128xf32>
    %c0_3 = arith.constant 0 : index
    %c0_4 = arith.constant 0 : index
    %3 = vector.load %arg3[%c0_3, %c0_4] : memref<32x1xf32, #tpu.memory_space<vmem>>, vector<32x1xf32>
    %4 = vector.broadcast %3 : vector<32x1xf32> to vector<32x128xf32>
    %5 = arith.addf %2, %4 : vector<32x128xf32>
    %cst_5 = arith.constant 0.000000e+00 : f32
    %6 = vector.broadcast %cst_5 : f32 to vector<32x128xf32>
    %7 = arith.maximumf %5, %6 : vector<32x128xf32>
    %c0_6 = arith.constant 0 : index
    %c0_7 = arith.constant 0 : index
    %8 = vector.load %arg4[%c0_6, %c0_7] : memref<16x32xf32, #tpu.memory_space<vmem>>, vector<16x32xf32>
    %cst_8 = arith.constant dense<0.000000e+00> : vector<16x128xf32>
    %9 = tpu.matmul %8, %7, %cst_8 {dimension_numbers = #tpu.dot_dimension_numbers<[1], [0], [0], [1], [0, 0, 1, 1], [], []>} : vector<16x32xf32>, vector<32x128xf32>, vector<16x128xf32> -> vector<16x128xf32>
    %c0_9 = arith.constant 0 : index
    %c0_10 = arith.constant 0 : index
    %10 = vector.load %arg5[%c0_9, %c0_10] : memref<16x1xf32, #tpu.memory_space<vmem>>, vector<16x1xf32>
    %11 = vector.broadcast %10 : vector<16x1xf32> to vector<16x128xf32>
    %12 = arith.addf %9, %11 : vector<16x128xf32>
    %cst_11 = arith.constant 0.000000e+00 : f32
    %13 = vector.broadcast %cst_11 : f32 to vector<16x128xf32>
    %14 = arith.maximumf %12, %13 : vector<16x128xf32>
    %c0_12 = arith.constant 0 : index
    %c0_13 = arith.constant 0 : index
    %15 = vector.load %arg6[%c0_12, %c0_13] : memref<8x16xf32, #tpu.memory_space<vmem>>, vector<8x16xf32>
    %cst_14 = arith.constant dense<0.000000e+00> : vector<8x128xf32>
    %16 = tpu.matmul %15, %14, %cst_14 {dimension_numbers = #tpu.dot_dimension_numbers<[1], [0], [0], [1], [0, 0, 1, 1], [], []>} : vector<8x16xf32>, vector<16x128xf32>, vector<8x128xf32> -> vector<8x128xf32>
    %c0_15 = arith.constant 0 : index
    %c0_16 = arith.constant 0 : index
    %17 = vector.load %arg7[%c0_15, %c0_16] : memref<8x1xf32, #tpu.memory_space<vmem>>, vector<8x1xf32>
    %18 = vector.broadcast %17 : vector<8x1xf32> to vector<8x128xf32>
    %19 = arith.addf %16, %18 : vector<8x128xf32>
    %cst_17 = arith.constant 0.000000e+00 : f32
    %20 = vector.broadcast %cst_17 : f32 to vector<8x128xf32>
    %21 = arith.maximumf %19, %20 : vector<8x128xf32>
    %c0_18 = arith.constant 0 : index
    %c0_19 = arith.constant 0 : index
    %22 = vector.load %arg8[%c0_18, %c0_19] : memref<8x128xf32, #tpu.memory_space<vmem>>, vector<8x128xf32>
    tpu.vector_store %arg8[%c0_18, %c0_19], %21 {strides = array<i32>} : memref<8x128xf32, #tpu.memory_space<vmem>>, vector<8x128xf32>,
    return
  }
  func.func @transform_0(%arg0: i32) -> (i32, i32) {
    %c0_i32 = arith.constant 0 : i32
    %c0_i32_0 = arith.constant 0 : i32
    return %arg0, %c0_i32 : i32, i32
  }
  func.func @transform_1(%arg0: i32) -> (i32, i32) {
    %c0_i32 = arith.constant 0 : i32
    %c0_i32_0 = arith.constant 0 : i32
    %c0_i32_1 = arith.constant 0 : i32
    return %c0_i32, %c0_i32_0 : i32, i32
  }
  func.func @transform_2(%arg0: i32) -> (i32, i32) {
    %c0_i32 = arith.constant 0 : i32
    %c0_i32_0 = arith.constant 0 : i32
    %c0_i32_1 = arith.constant 0 : i32
    return %c0_i32, %c0_i32_0 : i32, i32
  }
  func.func @transform_3(%arg0: i32) -> (i32, i32) {
    %c0_i32 = arith.constant 0 : i32
    %c0_i32_0 = arith.constant 0 : i32
    %c0_i32_1 = arith.constant 0 : i32
    return %c0_i32, %c0_i32_0 : i32, i32
  }
  func.func @transform_4(%arg0: i32) -> (i32, i32) {
    %c0_i32 = arith.constant 0 : i32
    %c0_i32_0 = arith.constant 0 : i32
    %c0_i32_1 = arith.constant 0 : i32
    return %c0_i32, %c0_i32_0 : i32, i32
  }
  func.func @transform_5(%arg0: i32) -> (i32, i32) {
    %c0_i32 = arith.constant 0 : i32
    %c0_i32_0 = arith.constant 0 : i32
    %c0_i32_1 = arith.constant 0 : i32
    return %c0_i32, %c0_i32_0 : i32, i32
  }
  func.func @transform_6(%arg0: i32) -> (i32, i32) {
    %c0_i32 = arith.constant 0 : i32
    %c0_i32_0 = arith.constant 0 : i32
    %c0_i32_1 = arith.constant 0 : i32
    return %c0_i32, %c0_i32_0 : i32, i32
  }
  func.func @transform_7(%arg0: i32) -> (i32, i32) {
    %c0_i32 = arith.constant 0 : i32
    %c0_i32_0 = arith.constant 0 : i32
    return %c0_i32, %arg0 : i32, i32
  }
}

</mosaic_0001>

<bundles_post_ra>
// kernel: tpu_custom_call.1
= control target key start
LH: loop header
LB: loop body
LE: loop exit
PB: predicated region body
PF: predicated region fallthrough
CT: control target
= control target key end

     0   :  { %12 = vsyncpa [#allocation3], 0  ;;  %s1262_s0 = inlined_call_operand.vmem [shape: f32[256,16], index: 0, kind: input, shape index: {}]   ;;  %s1263_s1 = inlined_call_operand.vmem [shape: f32[32,16], index: 1, kind: input, shape index: {}]   ;;  %s1264_s2 = inlined_call_operand.vmem [shape: f32[32,1], index: 2, kind: input, shape index: {}]   ;;  %s1265_s3 = inlined_call_operand.vmem [shape: f32[16,32], index: 3, kind: input, shape index: {}]   ;;  %s1266_s4 = inlined_call_operand.vmem [shape: f32[16,1], index: 4, kind: input, shape index: {}]   ;;  %s1267_s5 = inlined_call_operand.vmem [shape: f32[8,16], index: 5, kind: input, shape index: {}]   ;;  %s1268_s6 = inlined_call_operand.vmem [shape: f32[8,1], index: 6, kind: input, shape index: {}]   ;;  %s1269_s7 = inlined_call_operand.hbm [shape: f32[8,256], index: 7, kind: output, shape index: {}]  }
   0x1   :  { %14 = vsyncpa [#allocation3 + $0x1], 0  ;;  %s1058_s24 = smov 0   ;;  %s1060_s25 = smov 0  }
   0x2   :  { %s1062_s26 = smov 0   ;;  %s1064_s27 = smov 0  }
   0x3 LB: > { %s1079_s28 = sadd.s32 4294967295, %s1011_s27   ;;  %s726_s29 = sadd.s32 4294967294, %s1011_s27   ;;  %s1011_s27 = sphi %s1064_s27, %s1277_s27   ;;  %s1007_s26 = sphi %s1062_s26, %s1276_s26   ;;  %s1003_s25 = sphi %s1060_s25, %s1275_s25   ;;  %s999_s24 = sphi %s1058_s24, %s1274_s24  }
   0x4   : > { %s1083_s30 = sadd.s32 1, %s1011_s27   ;;  %s179_s8 = sadd.s32 1, %s1007_s26 }
   0x5   : > { %s176_s9 = ssub.s32 %s1011_s27, %s1083_s30  ;;  %p189_p0 = scmp.ne.s32.totalorder %s1007_s26, %s1003_s25 }
   0x6   : > { %p177_p1 = scmp.eq.s32.totalorder %s176_s9, 0  ;;  %p190_p2 = scmp.eq.s32.totalorder %s1079_s28, 1 }
   0x7   : > { %p195_p3 = scmp.ne.s32.totalorder %s1003_s25, %s999_s24  ;;  %p196_p4 = scmp.eq.s32.totalorder %s726_s29, 1 }
   0x8   : > { %s1094_s10 = scalar_select %p177_p1, %s1007_s26, %s179_s8  }
   0x9   : > { %p1096_p5 = por %p190_p2, %p189_p0  ;;  %p1100_p6 = por %p196_p4, %p195_p3 }
   0xa   : > { %p729_p7 = scmp.ge.s32.totalorder %s1011_s27, 1  ;;  %p241_p8 = scmp.lt.s32.totalorder %s1011_s27, 3 }
   0xc   : > { %p242_p9 = pnand %p729_p7, %p241_p8 }
   0xd   : > { %s731_s13 = sshll.u32 (!%p242_p9), %s1079_s28, 4  ;;  %vm323_vm0 = vcmask (!%p242_p9), 130048   ;;  %v295_v0 = vld [vmem:[%s1263_s1] sm:$0xff] (!%p242_p9)  ;;  %v1013_v1 = vmov (!%p242_p9), 0   ;;  %v301_v3 = vld [vmem:[%s1264_s2 + $0x10] sm:$0xff] (!%p242_p9)  ;;  %v300_v4 = vld [vmem:[%s1264_s2 + $0x8] sm:$0xff] (!%p242_p9) }
   0xe   : > { %245 = sbr.rel (%p242_p9) target bundleno = 770 (0x302), region = 48  ;;  %p274_p10 = scmp.lt.s32.totalorder (!%p242_p9), %s731_s13, 31  ;;  %821 = vmatprep.mubr.msk.f32.mxu0 (!%p242_p9), %vm323_vm0, %v295_v0  ;;  %947 = vset.pattern.permute.xlu0 (!%p242_p9), %v1013_v1  ;;  %v299_v2 = vld [vmem:[%s1264_s2] sm:$0xff] (!%p242_p9)  ;;  %v302_v5 = vld [vmem:[%s1264_s2 + $0x18] sm:$0xff] (!%p242_p9)  ;;  %vm1130_vm1 = vmpackc.low (!%p242_p9), %vm323_vm0, %vm323_vm0  ;;  %vm487_vm2 = vcmask (!%p242_p9), 261120   ;;  %v1014_v57 = vmov (!%p242_p9), 0.0|0.0  }
   0xf   : > { %305 = vperm.xlu0 (!%p242_p9), %947, %v299_v2   ;;  %948 = vset.pattern.permute.xlu1 (!%p242_p9), %v1013_v1  ;;  %v475_v7 = vld [vmem:[%s1266_s4] sm:$0xff] (!%p242_p9)  ;;  %v476_v13 = vld [vmem:[%s1266_s4 + $0x8] sm:$0xff] (!%p242_p9)  ;;  %v297_v35 = vld [vmem:[%s1263_s1 + $0x10] sm:$0xff] (!%p242_p9)  ;;  %vm1015_vm3 = vmmov (!%p242_p9), 0   ;;  %v1016_v58 = vmov (!%p242_p9), 0.0   ;;  %s270_s18 = sand.u32 (!%p242_p9), 1, %s1003_s25  }
  0x10   : > { %315 = vperm.xlu1 (!%p242_p9), %948, %v301_v3   ;;  %v572_v15 = vld [vmem:[%s1268_s6] sm:$0xff] (!%p242_p9)  ;;  %v296_v34 = vld [vmem:[%s1263_s1 + $0x8] sm:$0xff] (!%p242_p9)  ;;  %v298_v36 = vld [vmem:[%s1263_s1 + $0x18] sm:$0xff] (!%p242_p9)  ;;  %s730_s19 = sshll.u32 (!%p242_p9), %s270_s18, 3  ;;  %s757_s20 = sshll.u32 (!%p242_p9), %s1079_s28, 7 }
  0x11   : > { %v473_v37 = vld [vmem:[%s1265_s3] sm:$0xff] (!%p242_p9)  ;;  %v474_v56 = vld [vmem:[%s1265_s3 + $0x8] sm:$0xff] (!%p242_p9)  ;;  %s272_s21 = scalar_lea.vmem (!%p242_p9), [#allocation2], %s730_s19  ;;  %s1220_s8 = scalar_lea.hbm (!%p242_p9), %s1269_s7, %s757_s20 }
  0x12   : > { %835 = vmatprep.mubr.msk.f32.mxu1 (!%p242_p9), %vm487_vm2, %v473_v37  ;;  %s667_s22 = sshll.u32 (!%p242_p9), %s272_s21, 4  ;;  %s654_s9 = scalar_lea.sflag (!%p242_p9), [#allocation3], %s270_s18  ;;  %s1222_s22 = int_to_ptr.vmem [resolvable:$true] %s667_s22 }
  0x13   : > { %310 = vperm.xlu0 (!%p242_p9), %947, %v300_v4   ;;  %v571_v4 = vld [vmem:[%s1267_s5] sm:$0xff] (!%p242_p9)  ;;  %s1017_s28 = smov (!%p242_p9), [#allocation2]  }
  0x14   : > { %320 = vperm.xlu1 (!%p242_p9), %948, %v302_v5   ;;  %s953_s15 = sshll.u32 (!%p242_p9), %s1017_s28, 4  ;;  %s954_s15 = int_to_ptr.vmem [resolvable:$false] %s953_s15 }
  0x15   : > { %s1279_s13 = smov (!%p274_p10, %s731_s13), 31  ;;  %s955_s16 = scalar_lea.vmem %s954_s15, 256 }
  0x16   : > { %s732_s29 = sshll.u32 %s1279_s13, 3  ;;  %p956_p0 = scmp.lt.s32.totalorder %s1222_s22, %s954_s15 }
  0x17   : > { %s1126_s14 = scalar_lea.vmem %s1262_s0, %s732_s29  ;;  %479 = vperm.xlu0 %947, %v475_v7  }
  0x18   : > { %v279_v8 = vld [vmem:[%s1126_s14] sm:$0xff]  ;;  %v280_v9 = vld [vmem:[%s1126_s14 + $0x8] sm:$0xff]  ;;  %v281_v10 = vld [vmem:[%s1126_s14 + $0x10] sm:$0xff]  ;;  %484 = vperm.xlu1 %948, %v476_v13  }
  0x19   : > { %v845_v11 = vpack.c.bf16 %v280_v9, %v279_v8  ;;  %v282_v12 = vld [vmem:[%s1126_s14 + $0x18] sm:$0xff]  ;;  %v283_v16 = vld [vmem:[%s1126_s14 + $0x20] sm:$0xff]  ;;  %v284_v17 = vld [vmem:[%s1126_s14 + $0x28] sm:$0xff] }
  0x1a   : > { %v851_v14 = vpack.c.bf16 %v282_v12, %v281_v10  ;;  %v857_v18 = vpack.c.bf16 %v284_v17, %v283_v16  ;;  %v285_v19 = vld [vmem:[%s1126_s14 + $0x30] sm:$0xff]  ;;  %v286_v20 = vld [vmem:[%s1126_s14 + $0x38] sm:$0xff]  ;;  %v287_v22 = vld [vmem:[%s1126_s14 + $0x40] sm:$0xff] }
  0x1b   : > { %847 = vmatprep.subr.msk.bf16.mxu0 %vm1130_vm1, %v845_v11  ;;  %575 = vperm.xlu0 %947, %v572_v15   ;;  %v863_v21 = vpack.c.bf16 %v286_v20, %v285_v19  ;;  %v288_v23 = vld [vmem:[%s1126_s14 + $0x48] sm:$0xff]  ;;  %v289_v25 = vld [vmem:[%s1126_s14 + $0x50] sm:$0xff]  ;;  %v290_v26 = vld [vmem:[%s1126_s14 + $0x58] sm:$0xff] }
  0x1c   : > { %850 = vmatpush3.bf16.xpose.msk.msra.mxu0 %vm1130_vm1, %v845_v11  ;;  %v869_v24 = vpack.c.bf16 %v288_v23, %v287_v22  ;;  %v875_v27 = vpack.c.bf16 %v290_v26, %v289_v25  ;;  %v291_v28 = vld [vmem:[%s1126_s14 + $0x60] sm:$0xff]  ;;  %v292_v29 = vld [vmem:[%s1126_s14 + $0x68] sm:$0xff]  ;;  %v293_v31 = vld [vmem:[%s1126_s14 + $0x70] sm:$0xff] }
  0x1d   : > { %853 = vmatprep.subr.msk.bf16.mxu0 %vm1130_vm1, %v851_v14  ;;  %v881_v30 = vpack.c.bf16 %v292_v29, %v291_v28  ;;  %v294_v32 = vld [vmem:[%s1126_s14 + $0x78] sm:$0xff]  ;;  %s949_s14 = scalar_lea.vmem %s1222_s22, 128 }
  0x1e   : > { %v887_v33 = vpack.c.bf16 %v294_v32, %v293_v31  ;;  %p950_p11 = scmp.ne.s32.totalorder %s1222_s22, %s949_s14  ;;  %p957_p1 = scmp.lt.s32.totalorder %s955_s16, %s949_s14 }
  0x20   : > { %p951_p12 = pnand %p950_p11, %p1096_p5  ;;  %p958_p2 = por %p957_p1, %p956_p0 }
  0x22   : > { %p952_p13 = pneg %p951_p12 }
  0x24   : > { %856 = vmatpush3.bf16.xpose.msk.msra.mxu0 %vm1130_vm1, %v851_v14  ;;  %p959_p3 = pnand %p958_p2, %p952_p13 }
  0x25   : > { %859 = vmatprep.subr.msk.bf16.mxu0 %vm1130_vm1, %v857_v18 }
  0x2c   : > { %862 = vmatpush3.bf16.xpose.msk.msra.mxu0 %vm1130_vm1, %v857_v18 }
  0x2d   : > { %865 = vmatprep.subr.msk.bf16.mxu0 %vm1130_vm1, %v863_v21 }
  0x34   : > { %868 = vmatpush3.bf16.xpose.msk.msra.mxu0 %vm1130_vm1, %v863_v21 }
  0x35   : > { %871 = vmatprep.subr.msk.bf16.mxu0 %vm1130_vm1, %v869_v24 }
  0x3c   : > { %874 = vmatpush3.bf16.xpose.msk.msra.mxu0 %vm1130_vm1, %v869_v24 }
  0x3d   : > { %877 = vmatprep.subr.msk.bf16.mxu0 %vm1130_vm1, %v875_v27 }
  0x44   : > { %880 = vmatpush3.bf16.xpose.msk.msra.mxu0 %vm1130_vm1, %v875_v27 }
  0x45   : > { %883 = vmatprep.subr.msk.bf16.mxu0 %vm1130_vm1, %v881_v30 }
  0x4c   : > { %886 = vmatpush3.bf16.xpose.msk.msra.mxu0 %vm1130_vm1, %v881_v30 }
  0x4d   : > { %889 = vmatprep.subr.msk.bf16.mxu0 %vm1130_vm1, %v887_v33 }
  0x54   : > { %892 = vmatpush3.bf16.xpose.msk.msra.mxu0 %vm1130_vm1, %v887_v33 }
  0x5b   : > { %822 = vmatmul.mubr.msk.f32.vlgmr.msra.gmra.mrb[0].mxu0 %vm323_vm0, %v296_v34 }
  0x5c   : > { %824 = vmatprep.mubr.msk.f32.mxu0 %vm323_vm0, %v297_v35 }
  0x5f   : > { %825 = vmatmul.mubr.msk.f32.gmra.mrb[2].mxu0 %vm323_vm0, %v298_v36 }
  0x8e   : > { %v306_v38 = vpop.permute.xlu0 %305 }
  0x8f   : > { %v316_v39 = vpop.permute.xlu1 %315 }
  0x92   : > { %v311_v40 = vpop.permute.xlu0 %310 }
  0x93   : > { %v321_v46 = vpop.permute.xlu1 %320 }
  0x96   : > { %v480_v61 = vpop.permute.xlu0 %479 }
  0x97   : > { %v485_v59 = vpop.permute.xlu1 %484 }
  0x9a   : > { %v576_v5 = vpop.permute.xlu0 %575 }
 0x12e   : > { %v823_v41 = vpop.f32.mrb[0].mxu0 }
 0x12f   : > { %v456_v42 = vadd.f32 %v823_v41, %v311_v40  ;;  %v450_v43 = vpop.f32.mrb[1].mxu0 }
 0x130   : > { %v451_v44 = vadd.f32 %v450_v43, %v306_v38 }
 0x131   : > { %v470_v45 = vmax.f32 %v456_v42, 0.0 }
 0x132   : > { %v469_v47 = vmax.f32 %v451_v44, 0.0  ;;  %v826_v48 = vpop.f32.mrb[2].mxu0 }
 0x133   : > { %v466_v49 = vadd.f32 %v826_v48, %v321_v46  ;;  %v460_v50 = vpop.f32.mrb[3].mxu0 }
 0x134   : > { %v461_v51 = vadd.f32 %v460_v50, %v316_v39  ;;  %v893_v52 = vpack.c.bf16 %v470_v45, %v469_v47 }
 0x135   : > { %v472_v53 = vmax.f32 %v466_v49, 0.0 }
 0x136   : > { %v471_v54 = vmax.f32 %v461_v51, 0.0  ;;  %894 = vmatprep.subr.bf16.mxu1 %v893_v52 }
 0x137   : > { %896 = vmatpush3.bf16.msra.mxu1 %v893_v52 }
 0x138   : > { %v897_v55 = vpack.c.bf16 %v472_v53, %v471_v54 }
 0x13a   : > { %898 = vmatprep.subr.bf16.mxu1 %v897_v55 }
 0x13b   : > { %900 = vmatpush3.bf16.msra.mxu1 %v897_v55 }
 0x13c   : > { %901 = vmatprep.subr.bf16.mxu1 %v1014_v57 }
 0x13e   : > { %836 = vmatmul.mubr.msk.f32.vlgmr.msra.gmra.mrb[0].mxu1 %vm487_vm2, %v474_v56 }
 0x13f   : > { %842 = vmatprep.mubr.msk.f32.mxu1 %vm1015_vm3, %v1016_v58 }
 0x211   : > { %v837_v60 = vpop.f32.mrb[0].mxu1 }
 0x212   : > { %v566_v62 = vadd.f32 %v837_v60, %v485_v59  ;;  %v560_v63 = vpop.f32.mrb[1].mxu1 }
 0x213   : > { %v561_v0 = vadd.f32 %v560_v63, %v480_v61 }
 0x214   : > { %v570_v1 = vmax.f32 %v566_v62, 0.0 }
 0x215   : > { %v569_v2 = vmax.f32 %v561_v0, 0.0 }
 0x217   : > { %v902_v3 = vpack.c.bf16 %v570_v1, %v569_v2 }
 0x219   : > { %903 = vmatpush3.bf16.msra.mxu1 %v902_v3 }
 0x21c   : > { %843 = vmatmul.mubr.msk.f32.vlgmr.msra.gmra.mrb[2].mxu1 %vm323_vm0, %v571_v4 }
 0x2ef   : > { %v647_v6 = vpop.f32.mrb[2].mxu1 }
 0x2f0   : > { %v648_v7 = vadd.f32 %v647_v6, %v576_v5  ;;  %v844_v8 = vpop.f32.mrb[3].mxu1 }
 0x2f2   : > { %v651_v9 = vmax.f32 %v648_v7, 0.0 }
 0x2f4   : > { %652 = vst [vmem:[%s272_s21] sm:$0xff] %v651_v9 }
 0x2f5   : > { %962 = shalt.err (!%p959_p3)
}
 0x2f6   : > { %s963_s13 = scalar_lea.hbm %s1220_s8, 128  ;;  %s967_s19 = scalar_lea.hbm %s1269_s7, 256 }
 0x2f7   : > { %p964_p4 = scmp.ne.s32.totalorder %s1220_s8, %s963_s13  ;;  %p968_p9 = scmp.lt.u32.totalorder %s1220_s8, %s1269_s7 }
 0x2f8   : > { %p969_p10 = scmp.lt.u32.totalorder %s967_s19, %s963_s13  ;;  %p971_p12 = scmp.lt.u32.totalorder %s963_s13, %s1220_s8 }
 0x2f9   : > { %p965_p7 = pnand %p964_p4, %p1096_p5 }
 0x2fa   : > { %p970_p11 = por %p969_p10, %p968_p9 }
 0x2fb   : > { %p966_p8 = pneg %p965_p7 }
 0x2fc   : > { %p972_p13 = por %p971_p12, %p970_p11 }
 0x2fe   : > { %p973_p0 = pnand %p972_p13, %p966_p8 }
 0x300   : > { %976 = shalt.err (!%p973_p0)
}
 0x301   : > { %904 = dma.vmem_to_hbm [thread:$0]  (%p1096_p5), %s1222_s22, 128, %s1220_s8, %s654_s9  }
 0x302 PF: > { %p910_p1 = scmp.ge.s32.totalorder %s1011_s27, 2  ;;  %s679_s23 = sand.u32 1, %s999_s24  }
 0x303   : > { %s680_s29 = scalar_lea.sflag [#allocation3], %s679_s23 }
 0x304   : > { %p907_p2 = pnand %p910_p1, %p1100_p6 }
 0x306   : > { %994 = dma.done.wait (!%p907_p2), %s680_s29, 128  }
 0x307   : > { %996 = vsyncadd (!%p907_p2), %s680_s29, 4294967168  ;;  %p17_p3 = scmp.ge.s32.totalorder %s1083_s30, 4   ;;  %s1274_s24 = smov %s1003_s25 }
 0x308   : > { %s1275_s25 = smov %s1007_s26  ;;  %s1276_s26 = smov %s1094_s10 }
 0x309   : > { %s1277_s27 = smov %s1083_s30  ;;  %19 = sbr.rel (!%p17_p3) target bundleno = 3 (0x3), region = 83 }
 0x310   :  { %685 = vsyncpa [#allocation3], 1 }
 0x311   :  { %687 = vsyncpa [#allocation3 + $0x1], 1 }

</bundles_post_ra>
